<compile_context>
chip_gen: v6e
topology: v6e:2x2x1
jax: 0.10.0
libtpu: 0.0.40
codegen_flags: <defaults>
</compile_context>

<pallas_src>
import jax
import jax.numpy as jnp
from jax import lax
from jax.experimental import pallas as pl
from jax.experimental.pallas import tpu as pltpu


def _fcu_up_kernel(x_ref, w_ref, shift_ref, e_ref, o_ref):
    # x_ref:     (BB, N, Cin)     tokens of BB images (cls token in row 0)
    # w_ref:     (Cout, Cin)      1x1-conv weight with BN scale folded in
    # shift_ref: (Cout, 1) f32    folded conv-bias + BN shift
    # e_ref:     (N, M)           0/1 nearest-upsample selection (row 0 = cls -> dropped)
    # o_ref:     (BB, Cout, M)    final upsampled NCHW map, flat spatial on lanes
    sel_prec = lax.Precision.HIGHEST if e_ref.dtype == jnp.float32 else None

    def per_image(bb, carry):
        x = x_ref[bb]                                        # (N, Cin)
        # (Cout, Cin) . (N, Cin)^T -> (Cout, N): trans_b matmul, f32 acc on MXU.
        y = lax.dot_general(
            w_ref[...], x,
            dimension_numbers=(((1,), (1,)), ((), ())),
            preferred_element_type=jnp.float32)
        y = jnp.maximum(y + shift_ref[...], 0.0)             # BN shift + ReLU (f32)
        # Fused nearest upsample: one-hot column selection on the MXU.  The cls
        # column is multiplied by the all-zero row 0 of E and vanishes exactly.
        y = y.astype(e_ref.dtype)
        o_ref[bb] = lax.dot_general(
            y, e_ref[...],
            dimension_numbers=(((1,), (0,)), ((), ())),
            preferred_element_type=jnp.float32,
            precision=sel_prec,
        ).astype(o_ref.dtype)
        return carry

    lax.fori_loop(0, x_ref.shape[0], per_image, None, unroll=True)


def _vmem_capacity_bytes():
    """Physical per-core VMEM; conservative (v7x) fallback if the query fails."""
    try:
        cap = getattr(pltpu.get_tpu_info(), "vmem_capacity_bytes", None)
        if cap:
            return int(cap)
    except Exception:
        pass
    return 64 << 20


def _padded_vmem_bytes(rows, cols, itemsize):
    """Rough VMEM footprint of a 2-D operand (last two dims padded to (8, 128))."""
    return (-(-rows // 8) * 8) * (-(-cols // 128) * 128) * itemsize


def fcu_up_forward(x, H, W, params, up_stride, eps=1e-6, out_dtype=None):
    """x: (B, 1 + H*W, Cin) -> (B, Cout, H*up_stride, W*up_stride), NCHW."""
    B, N, Cin = x.shape
    assert N == 1 + H * W, (N, H, W)
    out_dtype = x.dtype if out_dtype is None else jnp.dtype(out_dtype)

    w = params["conv_w"]                    # (Cout, Cin)  squeezed 1x1 kernel
    bias = params["conv_b"]                 # (Cout,)
    gamma, beta = params["bn_gamma"], params["bn_beta"]
    mean, var = params["bn_mean"], params["bn_var"]
    Cout = w.shape[0]
    Hu, Wu = H * up_stride, W * up_stride
    M = Hu * Wu

    # Fold eval-mode BN into the conv (f32 fold, single cast to the matmul dtype):
    #   scale*(W x + bias - mean) + beta = (scale*W) x + (scale*(bias-mean)+beta)
    scale = gamma / jnp.sqrt(var + eps)                              # (Cout,)
    w_scaled = (w * scale[:, None]).astype(x.dtype)                  # (Cout, Cin)
    shift = ((bias - mean) * scale + beta).astype(jnp.float32).reshape(Cout, 1)

    # 0/1 nearest-upsample selection matrix: drops the cls row (row 0 all-zero)
    # and copies token (h, w) into its up_stride x up_stride output block.
    sel_dtype = jnp.float32 if out_dtype == jnp.float32 else jnp.bfloat16
    hu = jnp.arange(Hu) // up_stride
    wu = jnp.arange(Wu) // up_stride
    src = (1 + hu[:, None] * W + wu[None, :]).reshape(1, M)          # (1, M)
    expand = (jnp.arange(N).reshape(N, 1) == src).astype(sel_dtype)  # (N, M)

    # ---- block sizing: generation-aware VMEM budget -------------------------
    vmem_phys = _vmem_capacity_bytes()
    budget = min(int(vmem_phys * 0.6), 96 << 20)   # ~38 MiB on v7x, ~77 MiB on v5e/v6e

    itm_x = jnp.dtype(x.dtype).itemsize
    itm_o = jnp.dtype(out_dtype).itemsize
    img_in = N * Cin * itm_x
    img_out = Cout * M * itm_o
    # Constant operands; assume worst-case double-buffering (fallback path),
    # including the lane-padding of the (Cout, 1) shift to (Cout, 128).
    const_bytes = 2 * (_padded_vmem_bytes(Cout, Cin, itm_x)
                       + _padded_vmem_bytes(Cout, 1, 4)
                       + _padded_vmem_bytes(N, M, jnp.dtype(sel_dtype).itemsize))
    avail = max(budget - const_bytes - (4 << 20), 2 * (img_in + img_out))
    bb_max = int(max(1, avail // (2 * (img_in + img_out))))
    bb_max = min(bb_max, 64)
    if B >= 2:
        bb_max = min(bb_max, B // 2)   # keep >= 2 parallel grid steps (v7x: 2 TCs)
    # Largest batch-block that divides B (no partial tail blocks / masked stores).
    BB = max(d for d in range(1, min(bb_max, B) + 1) if B % d == 0)

    need = 2 * BB * (img_in + img_out) + const_bytes
    vmem_limit = int(min(budget, max(need + (2 << 20), 16 << 20)))

    def _call(single_buffer_consts):
        const_kw = {"pipeline_mode": pl.Buffered(1)} if single_buffer_consts else {}
        grid_spec = pltpu.PrefetchScalarGridSpec(
            num_scalar_prefetch=0,
            grid=(B // BB,),
            in_specs=[
                pl.BlockSpec((BB, N, Cin), lambda b: (b, 0, 0)),            # tokens
                pl.BlockSpec((Cout, Cin), lambda b: (0, 0), **const_kw),    # folded weight
                pl.BlockSpec((Cout, 1), lambda b: (0, 0), **const_kw),      # folded shift
                pl.BlockSpec((N, M), lambda b: (0, 0), **const_kw),         # upsample selector
            ],
            out_specs=pl.BlockSpec((BB, Cout, M), lambda b: (b, 0, 0)),
        )
        return pl.pallas_call(
            _fcu_up_kernel,
            out_shape=jax.ShapeDtypeStruct((B, Cout, M), out_dtype),
            grid_spec=grid_spec,
            compiler_params=pltpu.CompilerParams(
                dimension_semantics=("parallel",),
                vmem_limit_bytes=vmem_limit,
            ),
        )(x, w_scaled, shift, expand)

    try:
        out = _call(True)        # single-buffer the grid-invariant operands
    except Exception:            # pipeline_mode unsupported -> default double buffering
        out = _call(False)

    # Free reshape (contiguous split of the lane axis) to the NCHW output.
    return out.reshape(B, Cout, Hu, Wu)


def _reference(x, H, W, params, up_stride, eps=1e-6):
    """Pure-JAX f32 reference mirroring the PyTorch forward (eval-mode BN)."""
    B, N, Cin = x.shape
    xf = x.astype(jnp.float32)
    xr = jnp.transpose(xf[:, 1:, :], (0, 2, 1)).reshape(B, Cin, H, W)
    y = jnp.einsum("oi,bihw->bohw", params["conv_w"], xr)
    y = y + params["conv_b"][None, :, None, None]
    scale = params["bn_gamma"] / jnp.sqrt(params["bn_var"] + eps)
    y = (y - params["bn_mean"][None, :, None, None]) * scale[None, :, None, None]
    y = y + params["bn_beta"][None, :, None, None]
    y = jnp.maximum(y, 0.0)
    y = jnp.repeat(jnp.repeat(y, up_stride, axis=2), up_stride, axis=3)
    return y


if __name__ == "__main__":
    key = jax.random.PRNGKey(0)
    B, H, W = 2, 8, 8
    inplanes, outplanes, up_stride = 32, 16, 2

    k1, k2, k3, k4, k5, k6 = jax.random.split(key, 6)
    # Transformer tokens arrive in bf16 (halves HBM read traffic of this
    # bandwidth-bound kernel); parameters stay f32.
    x = jax.random.normal(k1, (B, 1 + H * W, inplanes), jnp.float32)
    x = x.astype(jnp.bfloat16)
    params = {
        "conv_w": 0.1 * jax.random.normal(k2, (outplanes, inplanes), jnp.float32),
        "conv_b": 0.1 * jax.random.normal(k3, (outplanes,), jnp.float32),
        "bn_gamma": 1.0 + 0.1 * jax.random.normal(k4, (outplanes,), jnp.float32),
        "bn_beta": 0.1 * jax.random.normal(k5, (outplanes,), jnp.float32),
        "bn_mean": 0.1 * jax.random.normal(k6, (outplanes,), jnp.float32),
        "bn_var": jnp.ones((outplanes,), jnp.float32),
    }

    out = jax.block_until_ready(fcu_up_forward(x, H, W, params, up_stride))

    assert out.shape == (B, outplanes, H * up_stride, W * up_stride), out.shape
    assert out.dtype == jnp.bfloat16, out.dtype

    ref = jax.block_until_ready(_reference(x, H, W, params, up_stride))
    err = float(jnp.max(jnp.abs(out.astype(jnp.float32) - ref)))
    assert jnp.allclose(out.astype(jnp.float32), ref, atol=5e-2, rtol=5e-2), err

    print("KERNEL_OK")
</pallas_src>

<mosaic_0001>
module attributes {stable_mosaic.version = 11 : i64} {
  func.func @_fcu_up_kernel(%arg0: i32, %arg1: memref<1x65x32xbf16, #tpu.memory_space<vmem>>, %arg2: memref<16x32xbf16, #tpu.memory_space<vmem>>, %arg3: memref<16x1xf32, #tpu.memory_space<vmem>>, %arg4: memref<65x256xbf16, #tpu.memory_space<vmem>>, %arg5: memref<1x16x256xbf16, #tpu.memory_space<vmem>>) attributes {dimension_semantics = [#tpu.dimension_semantics<parallel>], iteration_bounds = array<i64: 2>, scalar_prefetch = 0 : i64, scratch_operands = 0 : i64, tpu.core_type = #tpu.core_type<tc>, window_params = [{transform_indices = @transform_0, window_bounds = array<i64: 1, 65, 32>}, {pipeline_mode = #tpu.pipeline_mode<synchronous>, transform_indices = @transform_1, window_bounds = array<i64: 16, 32>}, {pipeline_mode = #tpu.pipeline_mode<synchronous>, transform_indices = @transform_2, window_bounds = array<i64: 16, 1>}, {pipeline_mode = #tpu.pipeline_mode<synchronous>, transform_indices = @transform_3, window_bounds = array<i64: 65, 256>}, {transform_indices = @transform_4, window_bounds = array<i64: 1, 16, 256>}]} {
    %c0_i32 = arith.constant 0 : i32
    %0 = arith.index_cast %c0_i32 : i32 to index
    %c0 = arith.constant 0 : index
    %c0_0 = arith.constant 0 : index
    %1 = vector.load %arg1[%0, %c0, %c0_0] : memref<1x65x32xbf16, #tpu.memory_space<vmem>>, vector<1x65x32xbf16>
    %2 = vector.shape_cast %1 : vector<1x65x32xbf16> to vector<65x32xbf16>
    %c0_1 = arith.constant 0 : index
    %c0_2 = arith.constant 0 : index
    %3 = vector.load %arg2[%c0_1, %c0_2] : memref<16x32xbf16, #tpu.memory_space<vmem>>, vector<16x32xbf16>
    %cst = arith.constant dense<0.000000e+00> : vector<16x65xf32>
    %4 = tpu.matmul %3, %2, %cst {dimension_numbers = #tpu.dot_dimension_numbers<[1], [1], [0], [0], [0, 0, 1, 0], [], []>} : vector<16x32xbf16>, vector<65x32xbf16>, vector<16x65xf32> -> vector<16x65xf32>
    %c0_3 = arith.constant 0 : index
    %c0_4 = arith.constant 0 : index
    %5 = vector.load %arg3[%c0_3, %c0_4] : memref<16x1xf32, #tpu.memory_space<vmem>>, vector<16x1xf32>
    %6 = vector.broadcast %5 : vector<16x1xf32> to vector<16x65xf32>
    %7 = arith.addf %4, %6 : vector<16x65xf32>
    %cst_5 = arith.constant 0.000000e+00 : f32
    %8 = vector.broadcast %cst_5 : f32 to vector<16x65xf32>
    %9 = arith.maximumf %7, %8 : vector<16x65xf32>
    %10 = arith.truncf %9 : vector<16x65xf32> to vector<16x65xbf16>
    %c0_6 = arith.constant 0 : index
    %c0_7 = arith.constant 0 : index
    %11 = vector.load %arg4[%c0_6, %c0_7] : memref<65x256xbf16, #tpu.memory_space<vmem>>, vector<65x256xbf16>
    %cst_8 = arith.constant dense<0.000000e+00> : vector<16x256xf32>
    %12 = tpu.matmul %10, %11, %cst_8 {dimension_numbers = #tpu.dot_dimension_numbers<[1], [0], [0], [1], [0, 0, 1, 1], [], []>} : vector<16x65xbf16>, vector<65x256xbf16>, vector<16x256xf32> -> vector<16x256xf32>
    %13 = arith.truncf %12 : vector<16x256xf32> to vector<16x256xbf16>
    %14 = arith.index_cast %c0_i32 : i32 to index
    %c0_9 = arith.constant 0 : index
    %c0_10 = arith.constant 0 : index
    %15 = vector.load %arg5[%14, %c0_9, %c0_10] : memref<1x16x256xbf16, #tpu.memory_space<vmem>>, vector<1x16x256xbf16>
    %16 = vector.shape_cast %15 : vector<1x16x256xbf16> to vector<16x256xbf16>
    %17 = vector.shape_cast %13 : vector<16x256xbf16> to vector<1x16x256xbf16>
    tpu.vector_store %arg5[%14, %c0_9, %c0_10], %17 {strides = array<i32>} : memref<1x16x256xbf16, #tpu.memory_space<vmem>>, vector<1x16x256xbf16>,
    %c1_i32 = arith.constant 1 : i32
    return
  }
  func.func @transform_0(%arg0: i32) -> (i32, i32, i32) {
    %c0_i32 = arith.constant 0 : i32
    %c0_i32_0 = arith.constant 0 : i32
    %c0_i32_1 = arith.constant 0 : i32
    return %arg0, %c0_i32, %c0_i32_0 : i32, i32, i32
  }
  func.func @transform_1(%arg0: i32) -> (i32, i32) {
    %c0_i32 = arith.constant 0 : i32
    %c0_i32_0 = arith.constant 0 : i32
    %c0_i32_1 = arith.constant 0 : i32
    return %c0_i32, %c0_i32_0 : i32, i32
  }
  func.func @transform_2(%arg0: i32) -> (i32, i32) {
    %c0_i32 = arith.constant 0 : i32
    %c0_i32_0 = arith.constant 0 : i32
    %c0_i32_1 = arith.constant 0 : i32
    return %c0_i32, %c0_i32_0 : i32, i32
  }
  func.func @transform_3(%arg0: i32) -> (i32, i32) {
    %c0_i32 = arith.constant 0 : i32
    %c0_i32_0 = arith.constant 0 : i32
    %c0_i32_1 = arith.constant 0 : i32
    return %c0_i32, %c0_i32_0 : i32, i32
  }
  func.func @transform_4(%arg0: i32) -> (i32, i32, i32) {
    %c0_i32 = arith.constant 0 : i32
    %c0_i32_0 = arith.constant 0 : i32
    %c0_i32_1 = arith.constant 0 : i32
    return %arg0, %c0_i32, %c0_i32_0 : i32, i32, i32
  }
}

module attributes {stable_mosaic.version = 11 : i64} {
  func.func @_fcu_up_kernel(%arg0: i32, %arg1: memref<1x65x32xbf16, #tpu.memory_space<vmem>>, %arg2: memref<16x32xbf16, #tpu.memory_space<vmem>>, %arg3: memref<16x1xf32, #tpu.memory_space<vmem>>, %arg4: memref<65x256xbf16, #tpu.memory_space<vmem>>, %arg5: memref<1x16x256xbf16, #tpu.memory_space<vmem>>) attributes {dimension_semantics = [#tpu.dimension_semantics<parallel>], iteration_bounds = array<i64: 2>, scalar_prefetch = 0 : i64, scratch_operands = 0 : i64, tpu.core_type = #tpu.core_type<tc>, window_params = [{transform_indices = @transform_0, window_bounds = array<i64: 1, 65, 32>}, {pipeline_mode = #tpu.pipeline_mode<synchronous>, transform_indices = @transform_1, window_bounds = array<i64: 16, 32>}, {pipeline_mode = #tpu.pipeline_mode<synchronous>, transform_indices = @transform_2, window_bounds = array<i64: 16, 1>}, {pipeline_mode = #tpu.pipeline_mode<synchronous>, transform_indices = @transform_3, window_bounds = array<i64: 65, 256>}, {transform_indices = @transform_4, window_bounds = array<i64: 1, 16, 256>}]} {
    %c0_i32 = arith.constant 0 : i32
    %0 = arith.index_cast %c0_i32 : i32 to index
    %c0 = arith.constant 0 : index
    %c0_0 = arith.constant 0 : index
    %1 = vector.load %arg1[%0, %c0, %c0_0] : memref<1x65x32xbf16, #tpu.memory_space<vmem>>, vector<1x65x32xbf16>
    %2 = vector.shape_cast %1 : vector<1x65x32xbf16> to vector<65x32xbf16>
    %c0_1 = arith.constant 0 : index
    %c0_2 = arith.constant 0 : index
    %3 = vector.load %arg2[%c0_1, %c0_2] : memref<16x32xbf16, #tpu.memory_space<vmem>>, vector<16x32xbf16>
    %cst = arith.constant dense<0.000000e+00> : vector<16x65xf32>
    %4 = tpu.matmul %3, %2, %cst {dimension_numbers = #tpu.dot_dimension_numbers<[1], [1], [0], [0], [0, 0, 1, 0], [], []>} : vector<16x32xbf16>, vector<65x32xbf16>, vector<16x65xf32> -> vector<16x65xf32>
    %c0_3 = arith.constant 0 : index
    %c0_4 = arith.constant 0 : index
    %5 = vector.load %arg3[%c0_3, %c0_4] : memref<16x1xf32, #tpu.memory_space<vmem>>, vector<16x1xf32>
    %6 = vector.broadcast %5 : vector<16x1xf32> to vector<16x65xf32>
    %7 = arith.addf %4, %6 : vector<16x65xf32>
    %cst_5 = arith.constant 0.000000e+00 : f32
    %8 = vector.broadcast %cst_5 : f32 to vector<16x65xf32>
    %9 = arith.maximumf %7, %8 : vector<16x65xf32>
    %10 = arith.truncf %9 : vector<16x65xf32> to vector<16x65xbf16>
    %c0_6 = arith.constant 0 : index
    %c0_7 = arith.constant 0 : index
    %11 = vector.load %arg4[%c0_6, %c0_7] : memref<65x256xbf16, #tpu.memory_space<vmem>>, vector<65x256xbf16>
    %cst_8 = arith.constant dense<0.000000e+00> : vector<16x256xf32>
    %12 = tpu.matmul %10, %11, %cst_8 {dimension_numbers = #tpu.dot_dimension_numbers<[1], [0], [0], [1], [0, 0, 1, 1], [], []>} : vector<16x65xbf16>, vector<65x256xbf16>, vector<16x256xf32> -> vector<16x256xf32>
    %13 = arith.truncf %12 : vector<16x256xf32> to vector<16x256xbf16>
    %14 = arith.index_cast %c0_i32 : i32 to index
    %c0_9 = arith.constant 0 : index
    %c0_10 = arith.constant 0 : index
    %15 = vector.load %arg5[%14, %c0_9, %c0_10] : memref<1x16x256xbf16, #tpu.memory_space<vmem>>, vector<1x16x256xbf16>
    %16 = vector.shape_cast %15 : vector<1x16x256xbf16> to vector<16x256xbf16>
    %17 = vector.shape_cast %13 : vector<16x256xbf16> to vector<1x16x256xbf16>
    tpu.vector_store %arg5[%14, %c0_9, %c0_10], %17 {strides = array<i32>} : memref<1x16x256xbf16, #tpu.memory_space<vmem>>, vector<1x16x256xbf16>,
    %c1_i32 = arith.constant 1 : i32
    return
  }
  func.func @transform_0(%arg0: i32) -> (i32, i32, i32) {
    %c0_i32 = arith.constant 0 : i32
    %c0_i32_0 = arith.constant 0 : i32
    %c0_i32_1 = arith.constant 0 : i32
    return %arg0, %c0_i32, %c0_i32_0 : i32, i32, i32
  }
  func.func @transform_1(%arg0: i32) -> (i32, i32) {
    %c0_i32 = arith.constant 0 : i32
    %c0_i32_0 = arith.constant 0 : i32
    %c0_i32_1 = arith.constant 0 : i32
    return %c0_i32, %c0_i32_0 : i32, i32
  }
  func.func @transform_2(%arg0: i32) -> (i32, i32) {
    %c0_i32 = arith.constant 0 : i32
    %c0_i32_0 = arith.constant 0 : i32
    %c0_i32_1 = arith.constant 0 : i32
    return %c0_i32, %c0_i32_0 : i32, i32
  }
  func.func @transform_3(%arg0: i32) -> (i32, i32) {
    %c0_i32 = arith.constant 0 : i32
    %c0_i32_0 = arith.constant 0 : i32
    %c0_i32_1 = arith.constant 0 : i32
    return %c0_i32, %c0_i32_0 : i32, i32
  }
  func.func @transform_4(%arg0: i32) -> (i32, i32, i32) {
    %c0_i32 = arith.constant 0 : i32
    %c0_i32_0 = arith.constant 0 : i32
    %c0_i32_1 = arith.constant 0 : i32
    return %arg0, %c0_i32, %c0_i32_0 : i32, i32, i32
  }
}

</mosaic_0001>

<bundles_post_ra>
// kernel: tpu_custom_call.1
= control target key start
LH: loop header
LB: loop body
LE: loop exit
PB: predicated region body
PF: predicated region fallthrough
CT: control target
= control target key end

     0   :  { %9 = vsyncpa [#allocation3], 0  ;;  %s868_s0 = inlined_call_operand.vmem [shape: bf16[2,65,32], index: 0, kind: input, shape index: {}]   ;;  %s869_s1 = inlined_call_operand.vmem [shape: bf16[16,32], index: 1, kind: input, shape index: {}]   ;;  %s870_s2 = inlined_call_operand.vmem [shape: f32[16,1], index: 2, kind: input, shape index: {}]   ;;  %s871_s3 = inlined_call_operand.vmem [shape: bf16[65,256], index: 3, kind: input, shape index: {}]   ;;  %s872_s4 = inlined_call_operand.hbm [shape: bf16[2,16,256], index: 4, kind: output, shape index: {}]  }
   0x1   :  { %11 = vsyncpa [#allocation3 + $0x1], 0  ;;  %s724_s15 = smov 0   ;;  %s726_s16 = smov 0  }
   0x2   :  { %s728_s17 = smov 0   ;;  %s730_s18 = smov 0  }
   0x3 LB: > { %s745_s19 = sadd.s32 4294967295, %s691_s18   ;;  %s511_s20 = sadd.s32 4294967294, %s691_s18   ;;  %s691_s18 = sphi %s730_s18, %s878_s18   ;;  %s687_s17 = sphi %s728_s17, %s877_s17   ;;  %s683_s16 = sphi %s726_s16, %s876_s16   ;;  %s679_s15 = sphi %s724_s15, %s875_s15  }
   0x4   : > { %s749_s21 = sadd.s32 1, %s691_s18   ;;  %s113_s22 = sadd.s32 1, %s687_s17 }
   0x5   : > { %s110_s23 = ssub.s32 %s691_s18, %s749_s21  ;;  %p123_p0 = scmp.ne.s32.totalorder %s687_s17, %s683_s16 }
   0x6   : > { %p111_p1 = scmp.eq.s32.totalorder %s110_s23, 0  ;;  %p124_p2 = scmp.eq.s32.totalorder %s745_s19, 1 }
   0x7   : > { %p129_p3 = scmp.ne.s32.totalorder %s683_s16, %s679_s15  ;;  %p130_p4 = scmp.eq.s32.totalorder %s511_s20, 1 }
   0x8   : > { %s760_s24 = scalar_select %p111_p1, %s687_s17, %s113_s22  }
   0x9   : > { %p762_p5 = por %p124_p2, %p123_p0  ;;  %p766_p6 = por %p130_p4, %p129_p3 }
   0xa   : > { %p514_p7 = scmp.ge.s32.totalorder %s691_s18, 1  ;;  %p165_p8 = scmp.lt.s32.totalorder %s691_s18, 3 }
   0xc   : > { %p166_p9 = pnand %p514_p7, %p165_p8 }
   0xd   : > { %p191_p10 = scmp.lt.s32.totalorder (!%p166_p9), %s745_s19, 1  ;;  %s544_s23 = sshll.u32 (!%p166_p9), %s745_s19, 8 }
   0xe   : > { %169 = sbr.rel (%p166_p9) target bundleno = 484 (0x1e4), region = 36 }
  0x13   : > { %v693_v0 = vmov 0.0   ;;  %vm694_vm0 = vmmov 0   ;;  %v208_v1 = vld [vmem:[%s870_s2] sm:$0xff]  ;;  %vm369_vm1 = vcmask 1040384   ;;  %s192_s29 = scalar_select %p191_p10, %s745_s19, 1  ;;  %v695_v2 = vmov 0  }
  0x14   : > { %551 = vmatprep.subr.bf16.mxu0 %v693_v0  ;;  %561 = vmatprep.mubr.msk.bf16.mxu0 %vm694_vm0, %v693_v0  ;;  %v319_v3 = vld [vmem:[%s871_s3 + $0x40] sm:$0x11]  ;;  %v371_v4 = vsel %vm369_vm1, 65535, %v695_v2  ;;  %v209_v7 = vld [vmem:[%s870_s2 + $0x8] sm:$0xff]  ;;  %v619_v10 = vld [vmem:[%s871_s3 + $0x34] ss:$8 sps:$4 sm:$0xff]  }
  0x15   : > { %610 = vset.pattern.permute.xlu0 %v695_v2  ;;  %410 = vmatprep.mubr.bf16.mxu1 %v695_v2  ;;  %v533_v5 = vcombine.high %v319_v3, %v319_v3  ;;  %v532_v6 = vcombine.low %v319_v3, %v319_v3  ;;  %s565_s6 = smul.u32 36, %s192_s29  ;;  %vm248_vm2 = vcmask 261120   ;;  %v621_v11 = vld [vmem:[%s871_s3 + $0x30] ss:$8 sps:$4 sm:$0xff]   ;;  %v622_v14 = vld [vmem:[%s871_s3 + $0x24] ss:$8 sps:$4 sm:$0xff]   ;;  %s826_s29 = scalar_lea.hbm %s872_s4, %s544_s23 }
  0x16   : > { %212 = vperm.xlu0 %610, %v208_v1   ;;  %v624_v16 = vld [vmem:[%s871_s3 + $0x20] ss:$8 sps:$4 sm:$0xff]   ;;  %v625_v25 = vld [vmem:[%s871_s3 + $0x14] ss:$8 sps:$4 sm:$0xff]   ;;  %v627_v26 = vld [vmem:[%s871_s3 + $0x10] ss:$8 sps:$4 sm:$0xff]  }
  0x17   : > { %v376_v8 = vand.u32 %v533_v5, %v371_v4  ;;  %v373_v9 = vand.u32 %v532_v6, %v371_v4  ;;  %s195_s13 = scalar_lea.vmem %s868_s0, %s565_s6  ;;  %v616_v24 = vld [vmem:[%s869_s1] sm:$0xff]   ;;  %vm365_vm3 = vcmask 531456   ;;  %s696_s19 = smov [#allocation2]  }
  0x18   : > { %v611_v12 = vld [vmem:[%s195_s13 + $0x20] ss:$0 sps:$4 sm:$0x11]   ;;  %v612_v15 = vld [vmem:[%s195_s13 + $0x18] sm:$0xff]   ;;  %v613_v18 = vld [vmem:[%s195_s13 + $0x10] sm:$0xff]   ;;  %s635_s6 = sshll.u32 %s696_s19, 4  ;;  %s636_s6 = int_to_ptr.vmem [resolvable:$false] %s635_s6 }
  0x19   : > { %384 = vmatprep.subr.bf16.mxu1 %v376_v8  ;;  %v265_v13 = vsel %vm248_vm2, %v611_v12, 0  ;;  %v262_v17 = vsel %vm248_vm2, %v612_v15, 0  ;;  %v259_v19 = vsel %vm248_vm2, %v613_v18, 0  ;;  %v614_v20 = vld [vmem:[%s195_s13 + $0x8] sm:$0xff]   ;;  %v615_v22 = vld [vmem:[%s195_s13] sm:$0xff]   ;;  %s188_s13 = sand.u32 1, %s683_s16  }
  0x1a   : > { %217 = vperm.xlu0 %610, %v209_v7   ;;  %385 = vmatpush1.bf16.msra.mxu1 %v373_v9  ;;  %v256_v21 = vsel %vm248_vm2, %v614_v20, 0  ;;  %v253_v23 = vsel %vm248_vm2, %v615_v22, 0  ;;  %v628_v27 = vld [vmem:[%s871_s3 + $0x4] ss:$8 sps:$4 sm:$0xff]   ;;  %v630_v28 = vld [vmem:[%s871_s3] ss:$8 sps:$4 sm:$0xff]  }
  0x1b   : > { %386 = vmatprep.subr.bf16.mxu1 %v619_v10  ;;  %552 = vmatpush3.bf16.xpose.msra.mxu0 %v265_v13  ;;  %s515_s14 = sshll.u32 %s188_s13, 4  ;;  %s828_s30 = scalar_lea.sflag [#allocation3], %s188_s13 }
  0x1c   : > { %553 = vmatprep.subr.bf16.mxu0 %v693_v0  ;;  %s190_s20 = scalar_lea.vmem [#allocation2], %s515_s14  ;;  %s637_s7 = scalar_lea.vmem %s636_s6, 512 }
  0x1d   : > { %s449_s22 = sshll.u32 %s190_s20, 4  ;;  %s821_s22 = int_to_ptr.vmem [resolvable:$true] %s449_s22 }
  0x1e   : > { %387 = vmatpush1.bf16.msra.mxu1 %v621_v11  ;;  %s631_s5 = scalar_lea.vmem %s821_s22, 256  ;;  %p638_p0 = scmp.lt.s32.totalorder %s821_s22, %s636_s6 }
  0x1f   : > { %388 = vmatprep.subr.bf16.mxu1 %v622_v14  ;;  %p632_p11 = scmp.ne.s32.totalorder %s821_s22, %s631_s5  ;;  %p639_p1 = scmp.lt.s32.totalorder %s637_s7, %s631_s5 }
  0x21   : > { %p633_p12 = pnand %p632_p11, %p762_p5  ;;  %p640_p2 = por %p639_p1, %p638_p0 }
  0x22   : > { %389 = vmatpush1.bf16.msra.mxu1 %v624_v16 }
  0x23   : > { %554 = vmatpush3.bf16.xpose.msra.mxu0 %v262_v17  ;;  %390 = vmatprep.subr.bf16.mxu1 %v625_v25  ;;  %p634_p13 = pneg %p633_p12 }
  0x24   : > { %555 = vmatprep.subr.bf16.mxu0 %v693_v0 }
  0x25   : > { %p641_p3 = pnand %p640_p2, %p634_p13 }
  0x26   : > { %391 = vmatpush1.bf16.msra.mxu1 %v627_v26 }
  0x27   : > { %392 = vmatprep.subr.bf16.mxu1 %v628_v27 }
  0x2a   : > { %393 = vmatpush1.bf16.msra.mxu1 %v630_v28 }
  0x2b   : > { %556 = vmatpush3.bf16.xpose.msra.mxu0 %v259_v19 }
  0x2c   : > { %557 = vmatprep.subr.bf16.mxu0 %v693_v0 }
  0x33   : > { %558 = vmatpush3.bf16.xpose.msra.mxu0 %v256_v21 }
  0x34   : > { %559 = vmatprep.subr.bf16.mxu0 %v693_v0 }
  0x3b   : > { %560 = vmatpush3.bf16.xpose.msra.mxu0 %v253_v23 }
  0x42   : > { %562 = vmatmul.mubr.msk.bf16.vlgmr.msra.gmra.mxu0 %vm248_vm2, %v616_v24 }
  0x91   : > { %v213_v29 = vpop.permute.xlu0 %212 }
  0x95   : > { %v218_v33 = vpop.permute.xlu0 %217 }
 0x102   : > { %v301_v30 = vpop.f32.mrf.mxu0 }
 0x103   : > { %v302_v32 = vadd.f32 %v301_v30, %v213_v29 }
 0x104   : > { %v563_v31 = vpop.f32.mrf.mxu0 }
 0x105   : > { %v308_v37 = vmax.f32 %v302_v32, 0.0 }
 0x106   : > { %v304_v34 = vpop.f32.mrf.mxu0 }
 0x107   : > { %v305_v35 = vadd.f32 %v304_v34, %v218_v33 }
 0x108   : > { %v564_v36 = vpop.f32.mrf.mxu0 }
 0x109   : > { %v309_v38 = vmax.f32 %v305_v35, 0.0 }
 0x10b   : > { %v310_v39 = vpack.c.bf16 %v309_v38, %v308_v37 }
 0x10d   : > { %534 = vmatmul.mubr.msk.bf16.vlgmr.msra.gmra.mxu1 %vm365_vm3, %v310_v39 }
 0x1cd   : > { %v412_v40 = vpop.f32.mrf.mxu1 }
 0x1cf   : > { %v414_v41 = vpop.f32.mrf.mxu1 }
 0x1d0   : > { %v542_v42 = vpack.c.bf16 %v414_v41, %v412_v40 }
 0x1d1   : > { %v416_v43 = vpop.f32.mrf.mxu1 }
 0x1d2   : > { %433 = vst [vmem:[%s190_s20] sm:$0xff] %v542_v42 }
 0x1d3   : > { %v418_v44 = vpop.f32.mrf.mxu1 }
 0x1d4   : > { %v543_v45 = vpack.c.bf16 %v418_v44, %v416_v43 }
 0x1d6   : > { %434 = vst [vmem:[%s190_s20 + $0x8] sm:$0xff] %v543_v45 }
 0x1d7   : > { %644 = shalt.err (!%p641_p3)
}
 0x1d8   : > { %s645_s8 = scalar_lea.hbm %s826_s29, 256  ;;  %s649_s11 = scalar_lea.hbm %s872_s4, 512 }
 0x1d9   : > { %p646_p4 = scmp.ne.s32.totalorder %s826_s29, %s645_s8  ;;  %p650_p9 = scmp.lt.s32.totalorder %s826_s29, %s872_s4 }
 0x1da   : > { %p651_p10 = scmp.lt.s32.totalorder %s649_s11, %s645_s8 }
 0x1db   : > { %p647_p7 = pnand %p646_p4, %p762_p5 }
 0x1dc   : > { %p652_p11 = por %p651_p10, %p650_p9 }
 0x1dd   : > { %p648_p8 = pneg %p647_p7 }
 0x1df   : > { %p653_p12 = pnand %p652_p11, %p648_p8 }
 0x1e1   : > { %656 = shalt.err (!%p653_p12)
}
 0x1e2   : > { %s697_s14 = smov 128   ;;  %s698_s20 = smov 8  }
 0x1e3   : > { %566 = dma.vmem_to_hbm [thread:$0]  (%p762_p5), %s821_s22, 256, %s826_s29, %s828_s30, %s697_s14, %s697_s14, %s698_s20  }
 0x1e4 PF: > { %p572_p13 = scmp.ge.s32.totalorder %s691_s18, 2  ;;  %s464_s23 = sand.u32 1, %s679_s15  }
 0x1e5   : > { %s465_s27 = scalar_lea.sflag [#allocation3], %s464_s23 }
 0x1e6   : > { %p569_p0 = pnand %p572_p13, %p766_p6 }
 0x1e8   : > { %p570_p1 = pneg %p569_p0 }
 0x1ea   : > { %674 = dma.done.wait (%p570_p1), %s465_s27, 256  }
 0x1eb   : > { %676 = vsyncadd (%p570_p1), %s465_s27, 4294967040  ;;  %p14_p2 = scmp.ge.s32.totalorder %s749_s21, 4   ;;  %s875_s15 = smov %s683_s16 }
 0x1ec   : > { %s876_s16 = smov %s687_s17  ;;  %s877_s17 = smov %s760_s24 }
 0x1ed   : > { %s878_s18 = smov %s749_s21  ;;  %16 = sbr.rel (!%p14_p2) target bundleno = 3 (0x3), region = 71 }
 0x1f2   :  { %470 = vsyncpa [#allocation3], 1 }
 0x1f3   :  { %472 = vsyncpa [#allocation3 + $0x1], 1 }

// kernel: tpu_custom_call.1
= control target key start
LH: loop header
LB: loop body
LE: loop exit
PB: predicated region body
PF: predicated region fallthrough
CT: control target
= control target key end

     0   :  { %9 = vsyncpa [#allocation3], 0  ;;  %s868_s0 = inlined_call_operand.vmem [shape: bf16[2,65,32], index: 0, kind: input, shape index: {}]   ;;  %s869_s1 = inlined_call_operand.vmem [shape: bf16[16,32], index: 1, kind: input, shape index: {}]   ;;  %s870_s2 = inlined_call_operand.vmem [shape: f32[16,1], index: 2, kind: input, shape index: {}]   ;;  %s871_s3 = inlined_call_operand.vmem [shape: bf16[65,256], index: 3, kind: input, shape index: {}]   ;;  %s872_s4 = inlined_call_operand.hbm [shape: bf16[2,16,256], index: 4, kind: output, shape index: {}]  }
   0x1   :  { %11 = vsyncpa [#allocation3 + $0x1], 0  ;;  %s724_s15 = smov 0   ;;  %s726_s16 = smov 0  }
   0x2   :  { %s728_s17 = smov 0   ;;  %s730_s18 = smov 0  }
   0x3 LB: > { %s745_s19 = sadd.s32 4294967295, %s691_s18   ;;  %s511_s20 = sadd.s32 4294967294, %s691_s18   ;;  %s691_s18 = sphi %s730_s18, %s878_s18   ;;  %s687_s17 = sphi %s728_s17, %s877_s17   ;;  %s683_s16 = sphi %s726_s16, %s876_s16   ;;  %s679_s15 = sphi %s724_s15, %s875_s15  }
   0x4   : > { %s749_s21 = sadd.s32 1, %s691_s18   ;;  %s113_s22 = sadd.s32 1, %s687_s17 }
   0x5   : > { %s110_s23 = ssub.s32 %s691_s18, %s749_s21  ;;  %p123_p0 = scmp.ne.s32.totalorder %s687_s17, %s683_s16 }
   0x6   : > { %p111_p1 = scmp.eq.s32.totalorder %s110_s23, 0  ;;  %p124_p2 = scmp.eq.s32.totalorder %s745_s19, 1 }
   0x7   : > { %p129_p3 = scmp.ne.s32.totalorder %s683_s16, %s679_s15  ;;  %p130_p4 = scmp.eq.s32.totalorder %s511_s20, 1 }
   0x8   : > { %s760_s24 = scalar_select %p111_p1, %s687_s17, %s113_s22  }
   0x9   : > { %p762_p5 = por %p124_p2, %p123_p0  ;;  %p766_p6 = por %p130_p4, %p129_p3 }
   0xa   : > { %p514_p7 = scmp.ge.s32.totalorder %s691_s18, 1  ;;  %p165_p8 = scmp.lt.s32.totalorder %s691_s18, 3 }
   0xc   : > { %p166_p9 = pnand %p514_p7, %p165_p8 }
   0xd   : > { %p191_p10 = scmp.lt.s32.totalorder (!%p166_p9), %s745_s19, 1  ;;  %s544_s23 = sshll.u32 (!%p166_p9), %s745_s19, 8 }
   0xe   : > { %169 = sbr.rel (%p166_p9) target bundleno = 484 (0x1e4), region = 36 }
  0x13   : > { %v693_v0 = vmov 0.0   ;;  %vm694_vm0 = vmmov 0   ;;  %v208_v1 = vld [vmem:[%s870_s2] sm:$0xff]  ;;  %vm369_vm1 = vcmask 1040384   ;;  %s192_s29 = scalar_select %p191_p10, %s745_s19, 1  ;;  %v695_v2 = vmov 0  }
  0x14   : > { %551 = vmatprep.subr.bf16.mxu0 %v693_v0  ;;  %561 = vmatprep.mubr.msk.bf16.mxu0 %vm694_vm0, %v693_v0  ;;  %v319_v3 = vld [vmem:[%s871_s3 + $0x40] sm:$0x11]  ;;  %v371_v4 = vsel %vm369_vm1, 65535, %v695_v2  ;;  %v209_v7 = vld [vmem:[%s870_s2 + $0x8] sm:$0xff]  ;;  %v619_v10 = vld [vmem:[%s871_s3 + $0x34] ss:$8 sps:$4 sm:$0xff]  }
  0x15   : > { %610 = vset.pattern.permute.xlu0 %v695_v2  ;;  %410 = vmatprep.mubr.bf16.mxu1 %v695_v2  ;;  %v533_v5 = vcombine.high %v319_v3, %v319_v3  ;;  %v532_v6 = vcombine.low %v319_v3, %v319_v3  ;;  %s565_s6 = smul.u32 36, %s192_s29  ;;  %vm248_vm2 = vcmask 261120   ;;  %v621_v11 = vld [vmem:[%s871_s3 + $0x30] ss:$8 sps:$4 sm:$0xff]   ;;  %v622_v14 = vld [vmem:[%s871_s3 + $0x24] ss:$8 sps:$4 sm:$0xff]   ;;  %s826_s29 = scalar_lea.hbm %s872_s4, %s544_s23 }
  0x16   : > { %212 = vperm.xlu0 %610, %v208_v1   ;;  %v624_v16 = vld [vmem:[%s871_s3 + $0x20] ss:$8 sps:$4 sm:$0xff]   ;;  %v625_v25 = vld [vmem:[%s871_s3 + $0x14] ss:$8 sps:$4 sm:$0xff]   ;;  %v627_v26 = vld [vmem:[%s871_s3 + $0x10] ss:$8 sps:$4 sm:$0xff]  }
  0x17   : > { %v376_v8 = vand.u32 %v533_v5, %v371_v4  ;;  %v373_v9 = vand.u32 %v532_v6, %v371_v4  ;;  %s195_s13 = scalar_lea.vmem %s868_s0, %s565_s6  ;;  %v616_v24 = vld [vmem:[%s869_s1] sm:$0xff]   ;;  %vm365_vm3 = vcmask 531456   ;;  %s696_s19 = smov [#allocation2]  }
  0x18   : > { %v611_v12 = vld [vmem:[%s195_s13 + $0x20] ss:$0 sps:$4 sm:$0x11]   ;;  %v612_v15 = vld [vmem:[%s195_s13 + $0x18] sm:$0xff]   ;;  %v613_v18 = vld [vmem:[%s195_s13 + $0x10] sm:$0xff]   ;;  %s635_s6 = sshll.u32 %s696_s19, 4  ;;  %s636_s6 = int_to_ptr.vmem [resolvable:$false] %s635_s6 }
  0x19   : > { %384 = vmatprep.subr.bf16.mxu1 %v376_v8  ;;  %v265_v13 = vsel %vm248_vm2, %v611_v12, 0  ;;  %v262_v17 = vsel %vm248_vm2, %v612_v15, 0  ;;  %v259_v19 = vsel %vm248_vm2, %v613_v18, 0  ;;  %v614_v20 = vld [vmem:[%s195_s13 + $0x8] sm:$0xff]   ;;  %v615_v22 = vld [vmem:[%s195_s13] sm:$0xff]   ;;  %s188_s13 = sand.u32 1, %s683_s16  }
  0x1a   : > { %217 = vperm.xlu0 %610, %v209_v7   ;;  %385 = vmatpush1.bf16.msra.mxu1 %v373_v9  ;;  %v256_v21 = vsel %vm248_vm2, %v614_v20, 0  ;;  %v253_v23 = vsel %vm248_vm2, %v615_v22, 0  ;;  %v628_v27 = vld [vmem:[%s871_s3 + $0x4] ss:$8 sps:$4 sm:$0xff]   ;;  %v630_v28 = vld [vmem:[%s871_s3] ss:$8 sps:$4 sm:$0xff]  }
  0x1b   : > { %386 = vmatprep.subr.bf16.mxu1 %v619_v10  ;;  %552 = vmatpush3.bf16.xpose.msra.mxu0 %v265_v13  ;;  %s515_s14 = sshll.u32 %s188_s13, 4  ;;  %s828_s30 = scalar_lea.sflag [#allocation3], %s188_s13 }
  0x1c   : > { %553 = vmatprep.subr.bf16.mxu0 %v693_v0  ;;  %s190_s20 = scalar_lea.vmem [#allocation2], %s515_s14  ;;  %s637_s7 = scalar_lea.vmem %s636_s6, 512 }
  0x1d   : > { %s449_s22 = sshll.u32 %s190_s20, 4  ;;  %s821_s22 = int_to_ptr.vmem [resolvable:$true] %s449_s22 }
  0x1e   : > { %387 = vmatpush1.bf16.msra.mxu1 %v621_v11  ;;  %s631_s5 = scalar_lea.vmem %s821_s22, 256  ;;  %p638_p0 = scmp.lt.s32.totalorder %s821_s22, %s636_s6 }
  0x1f   : > { %388 = vmatprep.subr.bf16.mxu1 %v622_v14  ;;  %p632_p11 = scmp.ne.s32.totalorder %s821_s22, %s631_s5  ;;  %p639_p1 = scmp.lt.s32.totalorder %s637_s7, %s631_s5 }
  0x21   : > { %p633_p12 = pnand %p632_p11, %p762_p5  ;;  %p640_p2 = por %p639_p1, %p638_p0 }
  0x22   : > { %389 = vmatpush1.bf16.msra.mxu1 %v624_v16 }
  0x23   : > { %554 = vmatpush3.bf16.xpose.msra.mxu0 %v262_v17  ;;  %390 = vmatprep.subr.bf16.mxu1 %v625_v25  ;;  %p634_p13 = pneg %p633_p12 }
  0x24   : > { %555 = vmatprep.subr.bf16.mxu0 %v693_v0 }
  0x25   : > { %p641_p3 = pnand %p640_p2, %p634_p13 }
  0x26   : > { %391 = vmatpush1.bf16.msra.mxu1 %v627_v26 }
  0x27   : > { %392 = vmatprep.subr.bf16.mxu1 %v628_v27 }
  0x2a   : > { %393 = vmatpush1.bf16.msra.mxu1 %v630_v28 }
  0x2b   : > { %556 = vmatpush3.bf16.xpose.msra.mxu0 %v259_v19 }
  0x2c   : > { %557 = vmatprep.subr.bf16.mxu0 %v693_v0 }
  0x33   : > { %558 = vmatpush3.bf16.xpose.msra.mxu0 %v256_v21 }
  0x34   : > { %559 = vmatprep.subr.bf16.mxu0 %v693_v0 }
  0x3b   : > { %560 = vmatpush3.bf16.xpose.msra.mxu0 %v253_v23 }
  0x42   : > { %562 = vmatmul.mubr.msk.bf16.vlgmr.msra.gmra.mxu0 %vm248_vm2, %v616_v24 }
  0x91   : > { %v213_v29 = vpop.permute.xlu0 %212 }
  0x95   : > { %v218_v33 = vpop.permute.xlu0 %217 }
 0x102   : > { %v301_v30 = vpop.f32.mrf.mxu0 }
 0x103   : > { %v302_v32 = vadd.f32 %v301_v30, %v213_v29 }
 0x104   : > { %v563_v31 = vpop.f32.mrf.mxu0 }
 0x105   : > { %v308_v37 = vmax.f32 %v302_v32, 0.0 }
 0x106   : > { %v304_v34 = vpop.f32.mrf.mxu0 }
 0x107   : > { %v305_v35 = vadd.f32 %v304_v34, %v218_v33 }
 0x108   : > { %v564_v36 = vpop.f32.mrf.mxu0 }
 0x109   : > { %v309_v38 = vmax.f32 %v305_v35, 0.0 }
 0x10b   : > { %v310_v39 = vpack.c.bf16 %v309_v38, %v308_v37 }
 0x10d   : > { %534 = vmatmul.mubr.msk.bf16.vlgmr.msra.gmra.mxu1 %vm365_vm3, %v310_v39 }
 0x1cd   : > { %v412_v40 = vpop.f32.mrf.mxu1 }
 0x1cf   : > { %v414_v41 = vpop.f32.mrf.mxu1 }
 0x1d0   : > { %v542_v42 = vpack.c.bf16 %v414_v41, %v412_v40 }
 0x1d1   : > { %v416_v43 = vpop.f32.mrf.mxu1 }
 0x1d2   : > { %433 = vst [vmem:[%s190_s20] sm:$0xff] %v542_v42 }
 0x1d3   : > { %v418_v44 = vpop.f32.mrf.mxu1 }
 0x1d4   : > { %v543_v45 = vpack.c.bf16 %v418_v44, %v416_v43 }
 0x1d6   : > { %434 = vst [vmem:[%s190_s20 + $0x8] sm:$0xff] %v543_v45 }
 0x1d7   : > { %644 = shalt.err (!%p641_p3)
}
 0x1d8   : > { %s645_s8 = scalar_lea.hbm %s826_s29, 256  ;;  %s649_s11 = scalar_lea.hbm %s872_s4, 512 }
 0x1d9   : > { %p646_p4 = scmp.ne.s32.totalorder %s826_s29, %s645_s8  ;;  %p650_p9 = scmp.lt.s32.totalorder %s826_s29, %s872_s4 }
 0x1da   : > { %p651_p10 = scmp.lt.s32.totalorder %s649_s11, %s645_s8 }
 0x1db   : > { %p647_p7 = pnand %p646_p4, %p762_p5 }
 0x1dc   : > { %p652_p11 = por %p651_p10, %p650_p9 }
 0x1dd   : > { %p648_p8 = pneg %p647_p7 }
 0x1df   : > { %p653_p12 = pnand %p652_p11, %p648_p8 }
 0x1e1   : > { %656 = shalt.err (!%p653_p12)
}
 0x1e2   : > { %s697_s14 = smov 128   ;;  %s698_s20 = smov 8  }
 0x1e3   : > { %566 = dma.vmem_to_hbm [thread:$0]  (%p762_p5), %s821_s22, 256, %s826_s29, %s828_s30, %s697_s14, %s697_s14, %s698_s20  }
 0x1e4 PF: > { %p572_p13 = scmp.ge.s32.totalorder %s691_s18, 2  ;;  %s464_s23 = sand.u32 1, %s679_s15  }
 0x1e5   : > { %s465_s27 = scalar_lea.sflag [#allocation3], %s464_s23 }
 0x1e6   : > { %p569_p0 = pnand %p572_p13, %p766_p6 }
 0x1e8   : > { %p570_p1 = pneg %p569_p0 }
 0x1ea   : > { %674 = dma.done.wait (%p570_p1), %s465_s27, 256  }
 0x1eb   : > { %676 = vsyncadd (%p570_p1), %s465_s27, 4294967040  ;;  %p14_p2 = scmp.ge.s32.totalorder %s749_s21, 4   ;;  %s875_s15 = smov %s683_s16 }
 0x1ec   : > { %s876_s16 = smov %s687_s17  ;;  %s877_s17 = smov %s760_s24 }
 0x1ed   : > { %s878_s18 = smov %s749_s21  ;;  %16 = sbr.rel (!%p14_p2) target bundleno = 3 (0x3), region = 71 }
 0x1f2   :  { %470 = vsyncpa [#allocation3], 1 }
 0x1f3   :  { %472 = vsyncpa [#allocation3 + $0x1], 1 }

</bundles_post_ra>
